<compile_context>
chip_gen: v7x
topology: tpu7x:2x2x1
jax: 0.10.0
libtpu: 0.0.40
codegen_flags: <defaults>
</compile_context>

<pallas_src>
import functools
import math

import jax
import jax.numpy as jnp
from jax.experimental import pallas as pl
from jax.experimental.pallas import tpu as pltpu


def _round_up(x, m):
    return ((x + m - 1) // m) * m


def _mlp_kernel(x_ref, w1_ref, b1_ref, w2_ref, b2_ref, w3_ref, b3_ref, o_ref):
    # Entire hot path (3 matmuls + biases + ReLUs) fused in one kernel, all
    # operands resident in VMEM for the current batch tile.  Matmuls use the
    # bf16 MXU path with f32 accumulation; bias add / ReLU done in f32.
    x = x_ref[...].astype(jnp.bfloat16)

    h1 = jnp.dot(x, w1_ref[...], preferred_element_type=jnp.float32) + b1_ref[...]
    h1 = jnp.maximum(h1, 0.0).astype(jnp.bfloat16)

    h2 = jnp.dot(h1, w2_ref[...], preferred_element_type=jnp.float32) + b2_ref[...]
    h2 = jnp.maximum(h2, 0.0).astype(jnp.bfloat16)

    out = jnp.dot(h2, w3_ref[...], preferred_element_type=jnp.float32) + b3_ref[...]
    o_ref[...] = out.astype(o_ref.dtype)


@functools.partial(jax.jit, static_argnames=("tile_b",))
def mlp_forward(x, w1, b1, w2, b2, w3, b3, *, tile_b=256):
    B, in_dim = x.shape
    hidden = w1.shape[1]
    out_dim = w3.shape[1]
    assert tile_b % 8 == 0, "tile_b must be a multiple of 8 (f32 sublane tiling)"

    # Pad feature dims to multiples of 128 (lane-dense matmuls + unmasked
    # stores) and batch to a multiple of tile_b.  Zero padding is exact through
    # matmul / bias / ReLU; padded rows & lanes are sliced off at the end.
    hid_p = _round_up(hidden, 128)
    out_p = _round_up(out_dim, 128)
    b_p = _round_up(B, tile_b)

    w1p = jnp.pad(w1, ((0, 0), (0, hid_p - hidden))).astype(jnp.bfloat16)
    b1p = jnp.pad(b1, ((0, 0), (0, hid_p - hidden)))
    w2p = jnp.pad(w2, ((0, hid_p - hidden), (0, hid_p - hidden))).astype(jnp.bfloat16)
    b2p = jnp.pad(b2, ((0, 0), (0, hid_p - hidden)))
    w3p = jnp.pad(w3, ((0, hid_p - hidden), (0, out_p - out_dim))).astype(jnp.bfloat16)
    b3p = jnp.pad(b3, ((0, 0), (0, out_p - out_dim)))
    xp = jnp.pad(x, ((0, b_p - B), (0, 0)))

    grid = (b_p // tile_b,)

    # Weights/biases are small and grid-invariant: replicate the full arrays.
    # (Considered pipeline_mode=pl.Buffered(1) here; savings are a few tens of
    #  KB of VMEM, skipped to keep the spec maximally portable.)
    full = lambda shape: pl.BlockSpec(shape, lambda i: (0,) * len(shape))

    flops = 2 * b_p * (in_dim * hid_p + hid_p * hid_p + hid_p * out_p)
    bytes_accessed = (
        b_p * in_dim * 4            # x (f32 in)
        + b_p * out_p * 4           # out (f32)
        + (in_dim * hid_p + hid_p * hid_p + hid_p * out_p) * 2   # bf16 weights
        + (2 * hid_p + out_p) * 4   # f32 biases
    )
    cost = pl.CostEstimate(flops=flops, transcendentals=0,
                           bytes_accessed=bytes_accessed)

    out = pl.pallas_call(
        _mlp_kernel,
        out_shape=jax.ShapeDtypeStruct((b_p, out_p), jnp.float32),
        grid_spec=pltpu.PrefetchScalarGridSpec(
            num_scalar_prefetch=0,
            grid=grid,
            in_specs=[
                pl.BlockSpec((tile_b, in_dim), lambda i: (i, 0)),  # x tile
                full((in_dim, hid_p)),   # w1 (bf16)
                full((1, hid_p)),        # b1
                full((hid_p, hid_p)),    # w2 (bf16)
                full((1, hid_p)),        # b2
                full((hid_p, out_p)),    # w3 (bf16)
                full((1, out_p)),        # b3
            ],
            out_specs=pl.BlockSpec((tile_b, out_p), lambda i: (i, 0)),
        ),
        compiler_params=pltpu.CompilerParams(
            dimension_semantics=("parallel",)),
        cost_estimate=cost,
    )(xp, w1p, b1p, w2p, b2p, w3p, b3p)

    return out[:B, :out_dim]


def xavier_uniform(key, fan_in, fan_out, gain):
    # Matches torch.nn.init.xavier_uniform_ semantics.
    bound = gain * math.sqrt(6.0 / (fan_in + fan_out))
    return jax.random.uniform(
        key, (fan_in, fan_out), minval=-bound, maxval=bound, dtype=jnp.float32)


def init_mlp_params(key, in_dim, hidden_dim, out_dim):
    gain = math.sqrt(2.0)  # nn.init.calculate_gain('relu')
    k1, k2, k3 = jax.random.split(key, 3)
    w1 = xavier_uniform(k1, in_dim, hidden_dim, gain)
    w2 = xavier_uniform(k2, hidden_dim, hidden_dim, gain)
    w3 = xavier_uniform(k3, hidden_dim, out_dim, gain)
    # biases filled with 0.01, kept as (1, N) for TPU-friendly 2D layout
    b1 = jnp.full((1, hidden_dim), 0.01, jnp.float32)
    b2 = jnp.full((1, hidden_dim), 0.01, jnp.float32)
    b3 = jnp.full((1, out_dim), 0.01, jnp.float32)
    return w1, b1, w2, b2, w3, b3


def reference_forward_f32(x, w1, b1, w2, b2, w3, b3):
    h1 = jnp.maximum(x @ w1 + b1, 0.0)
    h2 = jnp.maximum(h1 @ w2 + b2, 0.0)
    return h2 @ w3 + b3


def reference_forward_bf16(x, w1, b1, w2, b2, w3, b3):
    # Mirrors the kernel's arithmetic (bf16 matmul operands, f32 accumulate,
    # f32 bias/ReLU) for a tight numerical check.
    bf = jnp.bfloat16
    f32 = jnp.float32
    h1 = jnp.dot(x.astype(bf), w1.astype(bf), preferred_element_type=f32) + b1
    h1 = jnp.maximum(h1, 0.0)
    h2 = jnp.dot(h1.astype(bf), w2.astype(bf), preferred_element_type=f32) + b2
    h2 = jnp.maximum(h2, 0.0)
    return jnp.dot(h2.astype(bf), w3.astype(bf), preferred_element_type=f32) + b3


if __name__ == "__main__":
    in_dim, hidden_dim, out_dim = 16, 64, 8
    batch = 512        # 2 grid steps of 256 -> both v7x TensorCores get work
    tile_b = 256

    key = jax.random.PRNGKey(0)
    k_params, k_x = jax.random.split(key)
    params = init_mlp_params(k_params, in_dim, hidden_dim, out_dim)
    x = jax.random.normal(k_x, (batch, in_dim), dtype=jnp.float32)

    y = mlp_forward(x, *params, tile_b=tile_b)
    y = jax.block_until_ready(y)
    assert y.shape == (batch, out_dim)

    # Tight check vs. a reference that mimics the kernel's bf16-MXU arithmetic.
    y_bf16_ref = reference_forward_bf16(x, *params)
    assert jnp.allclose(y, y_bf16_ref, atol=5e-3, rtol=5e-3), \
        "mismatch vs bf16 reference"

    # Looser sanity check vs. the full-precision f32 reference (bf16 matmul
    # operands introduce ~1% error).
    y_f32_ref = reference_forward_f32(x, *params)
    assert jnp.allclose(y, y_f32_ref, atol=1e-1, rtol=1e-1), \
        "mismatch vs f32 reference"

    print("KERNEL_OK")
</pallas_src>

<mosaic_0001>
module attributes {stable_mosaic.version = 11 : i64} {
  func.func @_mlp_kernel(%arg0: i32, %arg1: memref<256x16xf32, #tpu.memory_space<vmem>>, %arg2: memref<16x128xbf16, #tpu.memory_space<vmem>>, %arg3: memref<1x128xf32, #tpu.memory_space<vmem>>, %arg4: memref<128x128xbf16, #tpu.memory_space<vmem>>, %arg5: memref<1x128xf32, #tpu.memory_space<vmem>>, %arg6: memref<128x128xbf16, #tpu.memory_space<vmem>>, %arg7: memref<1x128xf32, #tpu.memory_space<vmem>>, %arg8: memref<256x128xf32, #tpu.memory_space<vmem>>) attributes {dimension_semantics = [#tpu.dimension_semantics<parallel>], iteration_bounds = array<i64: 2>, scalar_prefetch = 0 : i64, scratch_operands = 0 : i64, tpu.core_type = #tpu.core_type<tc>, window_params = [{transform_indices = @transform_0, window_bounds = array<i64: 256, 16>}, {pipeline_mode = #tpu.pipeline_mode<synchronous>, transform_indices = @transform_1, window_bounds = array<i64: 16, 128>}, {pipeline_mode = #tpu.pipeline_mode<synchronous>, transform_indices = @transform_2, window_bounds = array<i64: 1, 128>}, {pipeline_mode = #tpu.pipeline_mode<synchronous>, transform_indices = @transform_3, window_bounds = array<i64: 128, 128>}, {pipeline_mode = #tpu.pipeline_mode<synchronous>, transform_indices = @transform_4, window_bounds = array<i64: 1, 128>}, {pipeline_mode = #tpu.pipeline_mode<synchronous>, transform_indices = @transform_5, window_bounds = array<i64: 128, 128>}, {pipeline_mode = #tpu.pipeline_mode<synchronous>, transform_indices = @transform_6, window_bounds = array<i64: 1, 128>}, {transform_indices = @transform_7, window_bounds = array<i64: 256, 128>}]} {
    %c0 = arith.constant 0 : index
    %c0_0 = arith.constant 0 : index
    %0 = vector.load %arg1[%c0, %c0_0] : memref<256x16xf32, #tpu.memory_space<vmem>>, vector<256x16xf32>
    %1 = arith.truncf %0 : vector<256x16xf32> to vector<256x16xbf16>
    %c0_1 = arith.constant 0 : index
    %c0_2 = arith.constant 0 : index
    %2 = vector.load %arg2[%c0_1, %c0_2] : memref<16x128xbf16, #tpu.memory_space<vmem>>, vector<16x128xbf16>
    %cst = arith.constant dense<0.000000e+00> : vector<256x128xf32>
    %3 = tpu.matmul %1, %2, %cst {dimension_numbers = #tpu.dot_dimension_numbers<[1], [0], [0], [1], [0, 0, 1, 1], [], []>} : vector<256x16xbf16>, vector<16x128xbf16>, vector<256x128xf32> -> vector<256x128xf32>
    %c0_3 = arith.constant 0 : index
    %c0_4 = arith.constant 0 : index
    %4 = vector.load %arg3[%c0_3, %c0_4] : memref<1x128xf32, #tpu.memory_space<vmem>>, vector<1x128xf32>
    %5 = vector.broadcast %4 : vector<1x128xf32> to vector<256x128xf32>
    %6 = arith.addf %3, %5 : vector<256x128xf32>
    %cst_5 = arith.constant 0.000000e+00 : f32
    %7 = vector.broadcast %cst_5 : f32 to vector<256x128xf32>
    %8 = arith.maximumf %6, %7 : vector<256x128xf32>
    %9 = arith.truncf %8 : vector<256x128xf32> to vector<256x128xbf16>
    %c0_6 = arith.constant 0 : index
    %c0_7 = arith.constant 0 : index
    %10 = vector.load %arg4[%c0_6, %c0_7] : memref<128x128xbf16, #tpu.memory_space<vmem>>, vector<128x128xbf16>
    %cst_8 = arith.constant dense<0.000000e+00> : vector<256x128xf32>
    %11 = tpu.matmul %9, %10, %cst_8 {dimension_numbers = #tpu.dot_dimension_numbers<[1], [0], [0], [1], [0, 0, 1, 1], [], []>} : vector<256x128xbf16>, vector<128x128xbf16>, vector<256x128xf32> -> vector<256x128xf32>
    %c0_9 = arith.constant 0 : index
    %c0_10 = arith.constant 0 : index
    %12 = vector.load %arg5[%c0_9, %c0_10] : memref<1x128xf32, #tpu.memory_space<vmem>>, vector<1x128xf32>
    %13 = vector.broadcast %12 : vector<1x128xf32> to vector<256x128xf32>
    %14 = arith.addf %11, %13 : vector<256x128xf32>
    %cst_11 = arith.constant 0.000000e+00 : f32
    %15 = vector.broadcast %cst_11 : f32 to vector<256x128xf32>
    %16 = arith.maximumf %14, %15 : vector<256x128xf32>
    %17 = arith.truncf %16 : vector<256x128xf32> to vector<256x128xbf16>
    %c0_12 = arith.constant 0 : index
    %c0_13 = arith.constant 0 : index
    %18 = vector.load %arg6[%c0_12, %c0_13] : memref<128x128xbf16, #tpu.memory_space<vmem>>, vector<128x128xbf16>
    %cst_14 = arith.constant dense<0.000000e+00> : vector<256x128xf32>
    %19 = tpu.matmul %17, %18, %cst_14 {dimension_numbers = #tpu.dot_dimension_numbers<[1], [0], [0], [1], [0, 0, 1, 1], [], []>} : vector<256x128xbf16>, vector<128x128xbf16>, vector<256x128xf32> -> vector<256x128xf32>
    %c0_15 = arith.constant 0 : index
    %c0_16 = arith.constant 0 : index
    %20 = vector.load %arg7[%c0_15, %c0_16] : memref<1x128xf32, #tpu.memory_space<vmem>>, vector<1x128xf32>
    %21 = vector.broadcast %20 : vector<1x128xf32> to vector<256x128xf32>
    %22 = arith.addf %19, %21 : vector<256x128xf32>
    %c0_17 = arith.constant 0 : index
    %c0_18 = arith.constant 0 : index
    %23 = vector.load %arg8[%c0_17, %c0_18] : memref<256x128xf32, #tpu.memory_space<vmem>>, vector<256x128xf32>
    tpu.vector_store %arg8[%c0_17, %c0_18], %22 {strides = array<i32>} : memref<256x128xf32, #tpu.memory_space<vmem>>, vector<256x128xf32>,
    return
  }
  func.func @transform_0(%arg0: i32) -> (i32, i32) {
    %c0_i32 = arith.constant 0 : i32
    %c0_i32_0 = arith.constant 0 : i32
    return %arg0, %c0_i32 : i32, i32
  }
  func.func @transform_1(%arg0: i32) -> (i32, i32) {
    %c0_i32 = arith.constant 0 : i32
    %c0_i32_0 = arith.constant 0 : i32
    %c0_i32_1 = arith.constant 0 : i32
    return %c0_i32, %c0_i32_0 : i32, i32
  }
  func.func @transform_2(%arg0: i32) -> (i32, i32) {
    %c0_i32 = arith.constant 0 : i32
    %c0_i32_0 = arith.constant 0 : i32
    %c0_i32_1 = arith.constant 0 : i32
    return %c0_i32, %c0_i32_0 : i32, i32
  }
  func.func @transform_3(%arg0: i32) -> (i32, i32) {
    %c0_i32 = arith.constant 0 : i32
    %c0_i32_0 = arith.constant 0 : i32
    %c0_i32_1 = arith.constant 0 : i32
    return %c0_i32, %c0_i32_0 : i32, i32
  }
  func.func @transform_4(%arg0: i32) -> (i32, i32) {
    %c0_i32 = arith.constant 0 : i32
    %c0_i32_0 = arith.constant 0 : i32
    %c0_i32_1 = arith.constant 0 : i32
    return %c0_i32, %c0_i32_0 : i32, i32
  }
  func.func @transform_5(%arg0: i32) -> (i32, i32) {
    %c0_i32 = arith.constant 0 : i32
    %c0_i32_0 = arith.constant 0 : i32
    %c0_i32_1 = arith.constant 0 : i32
    return %c0_i32, %c0_i32_0 : i32, i32
  }
  func.func @transform_6(%arg0: i32) -> (i32, i32) {
    %c0_i32 = arith.constant 0 : i32
    %c0_i32_0 = arith.constant 0 : i32
    %c0_i32_1 = arith.constant 0 : i32
    return %c0_i32, %c0_i32_0 : i32, i32
  }
  func.func @transform_7(%arg0: i32) -> (i32, i32) {
    %c0_i32 = arith.constant 0 : i32
    %c0_i32_0 = arith.constant 0 : i32
    return %arg0, %c0_i32 : i32, i32
  }
}

</mosaic_0001>

<bundles_post_ra>
// kernel: mlp_forward.1
= control target key start
LH: loop header
LB: loop body
LE: loop exit
PB: predicated region body
PF: predicated region fallthrough
CT: control target
= control target key end

     0   :  { %s1521_s24 = smov 0   ;;  %s1797_s0 = inlined_call_operand.vmem [shape: f32[512,16], index: 0, kind: input, shape index: {}]   ;;  %s1798_s1 = inlined_call_operand.vmem [shape: bf16[16,128], index: 1, kind: input, shape index: {}]   ;;  %s1799_s2 = inlined_call_operand.vmem [shape: f32[1,128], index: 2, kind: input, shape index: {}]   ;;  %s1800_s3 = inlined_call_operand.vmem [shape: bf16[128,128], index: 3, kind: input, shape index: {}]   ;;  %s1801_s4 = inlined_call_operand.vmem [shape: f32[1,128], index: 4, kind: input, shape index: {}]   ;;  %s1802_s5 = inlined_call_operand.vmem [shape: bf16[128,128], index: 5, kind: input, shape index: {}]   ;;  %s1803_s6 = inlined_call_operand.vmem [shape: f32[1,128], index: 6, kind: input, shape index: {}]   ;;  %s1804_s7 = inlined_call_operand.vmem [shape: f32[512,128], index: 7, kind: output, shape index: {}]  }
   0x1 LB: > { %s1204_s25 = sadd.s32 4294967295, %s1479_s24   ;;  %p1208_p0 = scmp.ge.s32.totalorder %s1479_s24, 1  ;;  %s1479_s24 = sphi %s1521_s24, %s17_s24  }
   0x2   : > { %p238_p1 = scmp.lt.s32.totalorder %s1479_s24, 3 }
   0x4   : > { %p239_p2 = pnand %p1208_p0, %p238_p1 }
   0x5   : > { %v1456_v0 = vld [vmem:[%s1798_s1] sm:$0xff] (!%p239_p2)   ;;  %s1209_s28 = sshll.u32 (!%p239_p2), %s1204_s25, 5  ;;  %vm346_vm0 = vcmask (!%p239_p2), 130048   ;;  %v1458_v23 = vld [vmem:[%s1800_s3 + $0x8] sm:$0xff] (!%p239_p2)   ;;  %v1459_v28 = vld [vmem:[%s1800_s3 + $0x10] sm:$0xff] (!%p239_p2)  }
   0x6   : > { %242 = sbr.rel (%p239_p2) target bundleno = 738 (0x2e2), region = 48  ;;  %p271_p3 = scmp.lt.s32.totalorder (!%p239_p2), %s1209_s28, 63  ;;  %1316 = vmatprep.subr.bf16.mxu0 (!%p239_p2), %v1456_v0  ;;  %1446 = vmatprep.subr.bf16.mxu1 (!%p239_p2), %v1456_v0  ;;  %v1457_v1 = vld [vmem:[%s1800_s3] sm:$0xff] (!%p239_p2)   ;;  %v1460_v37 = vld [vmem:[%s1800_s3 + $0x18] sm:$0xff] (!%p239_p2)   ;;  %v1462_v50 = vld [vmem:[%s1800_s3 + $0x28] sm:$0xff] (!%p239_p2)  }
   0x7   : > { %1317 = vmatpush3.bf16.msra.mxu0 (!%p239_p2), %v1456_v0  ;;  %1447 = vmatpush3.bf16.msra.mxu1 (!%p239_p2), %v1456_v0  ;;  %v1461_v45 = vld [vmem:[%s1800_s3 + $0x20] sm:$0xff] (!%p239_p2)   ;;  %v1463_v55 = vld [vmem:[%s1800_s3 + $0x30] sm:$0xff] (!%p239_p2)   ;;  %v1464_v56 = vld [vmem:[%s1800_s3 + $0x38] sm:$0xff] (!%p239_p2)  }
   0x8   : > { %1350 = vmatprep.subr.bf16.mxu1 (!%p239_p2), %v1457_v1  ;;  %v1465_v57 = vld [vmem:[%s1802_s5] sm:$0xff] (!%p239_p2)   ;;  %v1466_v58 = vld [vmem:[%s1802_s5 + $0x8] sm:$0xff] (!%p239_p2)   ;;  %v1467_v59 = vld [vmem:[%s1802_s5 + $0x10] sm:$0xff] (!%p239_p2)  }
   0x9   : > { %1398 = vmatprep.subr.bf16.mxu0 (!%p239_p2), %v1465_v57  ;;  %v1468_v60 = vld [vmem:[%s1802_s5 + $0x18] sm:$0xff] (!%p239_p2)   ;;  %v1469_v61 = vld [vmem:[%s1802_s5 + $0x20] sm:$0xff] (!%p239_p2)   ;;  %v1470_v62 = vld [vmem:[%s1802_s5 + $0x28] sm:$0xff] (!%p239_p2)  }
   0xa   : > { %v1635_v63 = vld [vmem:[%s1799_s2] ss:$0 sm:$0xff] (!%p239_p2) }
   0xd   : > { %s1806_s28 = smov (!%p271_p3, %s1209_s28), 63 }
   0xe   : > { %s1210_s8 = sshll.u32 %s1806_s28, 3 }
   0xf   : > { %s1543_s11 = scalar_lea.vmem %s1797_s0, %s1210_s8  ;;  %s1728_s10 = scalar_lea.vmem %s1804_s7, %s1210_s8 }
  0x10   : > { %v283_v2 = vld [vmem:[%s1543_s11] sm:$0xff]  ;;  %v284_v3 = vld [vmem:[%s1543_s11 + $0x8] sm:$0xff]  ;;  %v285_v4 = vld [vmem:[%s1543_s11 + $0x10] sm:$0xff] }
  0x11   : > { %v315_v5 = vpack.c.bf16 %v284_v3, %v283_v2  ;;  %v286_v6 = vld [vmem:[%s1543_s11 + $0x18] sm:$0xff]  ;;  %v287_v7 = vld [vmem:[%s1543_s11 + $0x20] sm:$0xff]  ;;  %v288_v8 = vld [vmem:[%s1543_s11 + $0x28] sm:$0xff] }
  0x12   : > { %v316_v9 = vpack.c.bf16 %v286_v6, %v285_v4  ;;  %v317_v10 = vpack.c.bf16 %v288_v8, %v287_v7  ;;  %v289_v11 = vld [vmem:[%s1543_s11 + $0x30] sm:$0xff]  ;;  %v290_v12 = vld [vmem:[%s1543_s11 + $0x38] sm:$0xff]  ;;  %v291_v13 = vld [vmem:[%s1543_s11 + $0x40] sm:$0xff] }
  0x13   : > { %1318 = vmatprep.mubr.msk.bf16.mxu0 %vm346_vm0, %v315_v5  ;;  %v292_v14 = vld [vmem:[%s1543_s11 + $0x48] sm:$0xff]  ;;  %v299_v15 = vld [vmem:[%s1543_s11 + $0x80] sm:$0xff]  ;;  %v301_v18 = vld [vmem:[%s1543_s11 + $0x90] sm:$0xff]  ;;  %v318_v24 = vpack.c.bf16 %v290_v12, %v289_v11 }
  0x14   : > { %1319 = vmatmul.mubr.msk.bf16.vlgmr.msra.gmra.mrb[0].mxu0 %vm346_vm0, %v316_v9  ;;  %v300_v16 = vld [vmem:[%s1543_s11 + $0x88] sm:$0xff]  ;;  %v302_v19 = vld [vmem:[%s1543_s11 + $0x98] sm:$0xff]  ;;  %v303_v20 = vld [vmem:[%s1543_s11 + $0xa0] sm:$0xff]  ;;  %v319_v26 = vpack.c.bf16 %v292_v14, %v291_v13 }
  0x15   : > { %1322 = vmatprep.mubr.msk.bf16.mxu0 %vm346_vm0, %v317_v10  ;;  %v323_v17 = vpack.c.bf16 %v300_v16, %v299_v15  ;;  %v324_v21 = vpack.c.bf16 %v302_v19, %v301_v18  ;;  %v304_v22 = vld [vmem:[%s1543_s11 + $0xa8] sm:$0xff]  ;;  %v305_v27 = vld [vmem:[%s1543_s11 + $0xb0] sm:$0xff]  ;;  %v306_v29 = vld [vmem:[%s1543_s11 + $0xb8] sm:$0xff]  ;;  %1399 = vmatpush3.bf16.msra.mxu0 %v1465_v57 }
  0x16   : > { %v325_v25 = vpack.c.bf16 %v304_v22, %v303_v20  ;;  %v307_v30 = vld [vmem:[%s1543_s11 + $0xc0] sm:$0xff]  ;;  %v308_v31 = vld [vmem:[%s1543_s11 + $0xc8] sm:$0xff]  ;;  %v293_v32 = vld [vmem:[%s1543_s11 + $0x50] sm:$0xff]  ;;  %v326_v36 = vpack.c.bf16 %v306_v29, %v305_v27  ;;  %1400 = vmatprep.subr.bf16.mxu0 %v1466_v58 }
  0x17   : > { %1334 = vmatprep.mubr.msk.bf16.mxu1 %vm346_vm0, %v323_v17  ;;  %v294_v33 = vld [vmem:[%s1543_s11 + $0x58] sm:$0xff]  ;;  %v295_v34 = vld [vmem:[%s1543_s11 + $0x60] sm:$0xff]  ;;  %v296_v35 = vld [vmem:[%s1543_s11 + $0x68] sm:$0xff]  ;;  %v327_v38 = vpack.c.bf16 %v308_v31, %v307_v30 }
  0x18   : > { %1335 = vmatmul.mubr.msk.bf16.vlgmr.msra.gmra.mrb[0].mxu1 %vm346_vm0, %v324_v21  ;;  %v320_v39 = vpack.c.bf16 %v294_v33, %v293_v32  ;;  %v321_v40 = vpack.c.bf16 %v296_v35, %v295_v34  ;;  %v309_v41 = vld [vmem:[%s1543_s11 + $0xd0] sm:$0xff]  ;;  %v310_v42 = vld [vmem:[%s1543_s11 + $0xd8] sm:$0xff]  ;;  %v311_v43 = vld [vmem:[%s1543_s11 + $0xe0] sm:$0xff] }
  0x19   : > { %1338 = vmatprep.mubr.msk.bf16.mxu1 %vm346_vm0, %v325_v25  ;;  %1351 = vmatpush3.bf16.msra.mxu1 %v1457_v1  ;;  %v312_v44 = vld [vmem:[%s1543_s11 + $0xe8] sm:$0xff]  ;;  %v297_v46 = vld [vmem:[%s1543_s11 + $0x70] sm:$0xff]  ;;  %v298_v47 = vld [vmem:[%s1543_s11 + $0x78] sm:$0xff]  ;;  %v328_v48 = vpack.c.bf16 %v310_v42, %v309_v41 }
  0x1a   : > { %1352 = vmatprep.subr.bf16.mxu1 %v1458_v23  ;;  %v329_v49 = vpack.c.bf16 %v312_v44, %v311_v43  ;;  %v322_v51 = vpack.c.bf16 %v298_v47, %v297_v46  ;;  %v313_v52 = vld [vmem:[%s1543_s11 + $0xf0] sm:$0xff]  ;;  %v314_v53 = vld [vmem:[%s1543_s11 + $0xf8] sm:$0xff]  ;;  %1401 = vmatpush3.bf16.msra.mxu0 %v1466_v58 }
  0x1b   : > { %v330_v54 = vpack.c.bf16 %v314_v53, %v313_v52  ;;  %1402 = vmatprep.subr.bf16.mxu0 %v1467_v59 }
  0x1c   : > { %1323 = vmatmul.mubr.msk.bf16.gmra.mrb[4].mxu0 %vm346_vm0, %v318_v24 }
  0x1d   : > { %1326 = vmatprep.mubr.msk.bf16.mxu0 %vm346_vm0, %v319_v26  ;;  %1353 = vmatpush3.bf16.msra.mxu1 %v1458_v23 }
  0x1e   : > { %1354 = vmatprep.subr.bf16.mxu1 %v1459_v28  ;;  %1403 = vmatpush3.bf16.msra.mxu0 %v1467_v59 }
  0x1f   : > { %1404 = vmatprep.subr.bf16.mxu0 %v1468_v60 }
  0x20   : > { %1339 = vmatmul.mubr.msk.bf16.gmra.mrb[4].mxu1 %vm346_vm0, %v326_v36 }
  0x21   : > { %1342 = vmatprep.mubr.msk.bf16.mxu1 %vm346_vm0, %v327_v38  ;;  %1355 = vmatpush3.bf16.msra.mxu1 %v1459_v28 }
  0x22   : > { %1356 = vmatprep.subr.bf16.mxu1 %v1460_v37  ;;  %1405 = vmatpush3.bf16.msra.mxu0 %v1468_v60 }
  0x23   : > { %1406 = vmatprep.subr.bf16.mxu0 %v1469_v61 }
  0x24   : > { %1327 = vmatmul.mubr.msk.bf16.gmra.mrb[8].mxu0 %vm346_vm0, %v320_v39 }
  0x25   : > { %1330 = vmatprep.mubr.msk.bf16.mxu0 %vm346_vm0, %v321_v40  ;;  %1357 = vmatpush3.bf16.msra.mxu1 %v1460_v37 }
  0x26   : > { %1358 = vmatprep.subr.bf16.mxu1 %v1461_v45  ;;  %1407 = vmatpush3.bf16.msra.mxu0 %v1469_v61 }
  0x27   : > { %1408 = vmatprep.subr.bf16.mxu0 %v1470_v62 }
  0x28   : > { %1343 = vmatmul.mubr.msk.bf16.gmra.mrb[8].mxu1 %vm346_vm0, %v328_v48 }
  0x29   : > { %1346 = vmatprep.mubr.msk.bf16.mxu1 %vm346_vm0, %v329_v49  ;;  %1359 = vmatpush3.bf16.msra.mxu1 %v1461_v45 }
  0x2a   : > { %1360 = vmatprep.subr.bf16.mxu1 %v1462_v50  ;;  %1409 = vmatpush3.bf16.msra.mxu0 %v1470_v62 }
  0x2c   : > { %1331 = vmatmul.mubr.msk.bf16.gmra.mrb[12].mxu0 %vm346_vm0, %v322_v51 }
  0x2d   : > { %1361 = vmatpush3.bf16.msra.mxu1 %v1462_v50 }
  0x2e   : > { %1362 = vmatprep.subr.bf16.mxu1 %v1463_v55 }
  0x30   : > { %1347 = vmatmul.mubr.msk.bf16.gmra.mrb[12].mxu1 %vm346_vm0, %v330_v54 }
  0x31   : > { %1363 = vmatpush3.bf16.msra.mxu1 %v1463_v55 }
  0x32   : > { %1364 = vmatprep.subr.bf16.mxu1 %v1464_v56 }
  0x35   : > { %1365 = vmatpush3.bf16.msra.mxu1 %v1464_v56 }
  0xe7   : > { %v1320_v0 = vpop.f32.mrb[0].mxu0 }
  0xe8   : > { %v438_v1 = vadd.f32 %v1320_v0, %v1635_v63  ;;  %v429_v2 = vpop.f32.mrb[1].mxu0 }
  0xe9   : > { %v430_v3 = vadd.f32 %v1635_v63, %v429_v2  ;;  %v1321_v4 = vpop.f32.mrb[2].mxu0 }
  0xea   : > { %v441_v5 = vadd.f32 %v1321_v4, %v1635_v63  ;;  %v432_v6 = vpop.f32.mrb[3].mxu0  ;;  %v558_v8 = vmax.f32 %v438_v1, 0.0 }
  0xeb   : > { %v433_v7 = vadd.f32 %v1635_v63, %v432_v6  ;;  %v1336_v10 = vpop.f32.mrb[0].mxu1  ;;  %v556_v11 = vmax.f32 %v430_v3, 0.0 }
  0xec   : > { %v559_v9 = vmax.f32 %v441_v5, 0.0  ;;  %v502_v13 = vadd.f32 %v1336_v10, %v1635_v63  ;;  %v493_v14 = vpop.f32.mrb[1].mxu1 }
  0xed   : > { %v557_v12 = vmax.f32 %v433_v7, 0.0  ;;  %v494_v16 = vadd.f32 %v1635_v63, %v493_v14  ;;  %v1337_v17 = vpop.f32.mrb[2].mxu1 }
  0xee   : > { %v589_v15 = vpack.c.bf16 %v559_v9, %v558_v8  ;;  %v574_v20 = vmax.f32 %v502_v13, 0.0  ;;  %v505_v21 = vadd.f32 %v1337_v17, %v1635_v63  ;;  %v496_v22 = vpop.f32.mrb[3].mxu1 }
  0xef   : > { %v588_v18 = vpack.c.bf16 %v557_v12, %v556_v11  ;;  %v1324_v19 = vpop.f32.mrb[4].mxu0  ;;  %v572_v25 = vmax.f32 %v494_v16, 0.0  ;;  %v497_v26 = vadd.f32 %v1635_v63, %v496_v22 }
  0xf0   : > { %v454_v23 = vadd.f32 %v1324_v19, %v1635_v63  ;;  %v445_v24 = vpop.f32.mrb[5].mxu0  ;;  %v575_v29 = vmax.f32 %v505_v21, 0.0 }
  0xf1   : > { %v446_v27 = vadd.f32 %v1635_v63, %v445_v24  ;;  %v1325_v28 = vpop.f32.mrb[6].mxu0  ;;  %1366 = vmatprep.mubr.bf16.mxu1 %v588_v18  ;;  %v573_v32 = vmax.f32 %v497_v26, 0.0 }
  0xf2   : > { %v457_v30 = vadd.f32 %v1325_v28, %v1635_v63  ;;  %v448_v31 = vpop.f32.mrb[7].mxu0  ;;  %1367 = vmatmul.mubr.bf16.vlgmr.msra.gmra.mrb[16].mxu1 %v589_v15  ;;  %v1649_v34 = vpack.c.bf16 %v575_v29, %v574_v20  ;;  %v562_v35 = vmax.f32 %v454_v23, 0.0 }
  0xf3   : > { %v449_v33 = vadd.f32 %v1635_v63, %v448_v31  ;;  %v1651_v37 = vpack.c.bf16 %v573_v32, %v572_v25  ;;  %v1340_v38 = vpop.f32.mrb[4].mxu1  ;;  %v560_v39 = vmax.f32 %v446_v27, 0.0 }
  0xf4   : > { %v563_v36 = vmax.f32 %v457_v30, 0.0  ;;  %v518_v41 = vadd.f32 %v1340_v38, %v1635_v63  ;;  %v509_v42 = vpop.f32.mrb[5].mxu1 }
  0xf5   : > { %v561_v40 = vmax.f32 %v449_v33, 0.0  ;;  %v510_v44 = vadd.f32 %v1635_v63, %v509_v42  ;;  %v1341_v45 = vpop.f32.mrb[6].mxu1 }
  0xf6   : > { %v591_v43 = vpack.c.bf16 %v563_v36, %v562_v35  ;;  %v578_v48 = vmax.f32 %v518_v41, 0.0  ;;  %v521_v49 = vadd.f32 %v1341_v45, %v1635_v63  ;;  %v512_v50 = vpop.f32.mrb[7].mxu1 }
  0xf7   : > { %v590_v46 = vpack.c.bf16 %v561_v40, %v560_v39  ;;  %v1328_v47 = vpop.f32.mrb[8].mxu0  ;;  %v576_v53 = vmax.f32 %v510_v44, 0.0  ;;  %v513_v54 = vadd.f32 %v1635_v63, %v512_v50 }
  0xf8   : > { %v470_v51 = vadd.f32 %v1328_v47, %v1635_v63  ;;  %v461_v52 = vpop.f32.mrb[9].mxu0  ;;  %v579_v57 = vmax.f32 %v521_v49, 0.0 }
  0xf9   : > { %v462_v55 = vadd.f32 %v1635_v63, %v461_v52  ;;  %v1329_v56 = vpop.f32.mrb[10].mxu0  ;;  %1370 = vmatprep.mubr.bf16.mxu1 %v590_v46  ;;  %v577_v60 = vmax.f32 %v513_v54, 0.0 }
  0xfa   : > { %v473_v58 = vadd.f32 %v1329_v56, %v1635_v63  ;;  %v464_v59 = vpop.f32.mrb[11].mxu0  ;;  %1371 = vmatmul.mubr.bf16.gmra.mrb[20].mxu1 %v591_v43  ;;  %v599_v62 = vpack.c.bf16 %v579_v57, %v578_v48  ;;  %v566_v0 = vmax.f32 %v470_v51, 0.0 }
  0xfb   : > { %v465_v61 = vadd.f32 %v1635_v63, %v464_v59  ;;  %v598_v2 = vpack.c.bf16 %v577_v60, %v576_v53  ;;  %v1344_v3 = vpop.f32.mrb[8].mxu1  ;;  %v564_v4 = vmax.f32 %v462_v55, 0.0 }
  0xfc   : > { %v567_v1 = vmax.f32 %v473_v58, 0.0  ;;  %v534_v6 = vadd.f32 %v1344_v3, %v1635_v63  ;;  %v525_v7 = vpop.f32.mrb[9].mxu1 }
  0xfd   : > { %v565_v5 = vmax.f32 %v465_v61, 0.0  ;;  %v526_v9 = vadd.f32 %v1635_v63, %v525_v7  ;;  %v1345_v10 = vpop.f32.mrb[10].mxu1 }
  0xfe   : > { %v593_v8 = vpack.c.bf16 %v567_v1, %v566_v0  ;;  %v582_v13 = vmax.f32 %v534_v6, 0.0  ;;  %v537_v14 = vadd.f32 %v1345_v10, %v1635_v63  ;;  %v528_v15 = vpop.f32.mrb[11].mxu1 }
  0xff   : > { %v592_v11 = vpack.c.bf16 %v565_v5, %v564_v4  ;;  %v1332_v12 = vpop.f32.mrb[12].mxu0  ;;  %v580_v18 = vmax.f32 %v526_v9, 0.0  ;;  %v529_v19 = vadd.f32 %v1635_v63, %v528_v15 }
 0x100   : > { %v486_v16 = vadd.f32 %v1332_v12, %v1635_v63  ;;  %v477_v17 = vpop.f32.mrb[13].mxu0  ;;  %v583_v22 = vmax.f32 %v537_v14, 0.0 }
 0x101   : > { %v478_v20 = vadd.f32 %v1635_v63, %v477_v17  ;;  %v1333_v21 = vpop.f32.mrb[14].mxu0  ;;  %1374 = vmatprep.mubr.bf16.mxu1 %v592_v11  ;;  %v581_v25 = vmax.f32 %v529_v19, 0.0 }
 0x102   : > { %v489_v23 = vadd.f32 %v1333_v21, %v1635_v63  ;;  %v480_v24 = vpop.f32.mrb[15].mxu0  ;;  %1375 = vmatmul.mubr.bf16.gmra.mrb[24].mxu1 %v593_v8  ;;  %v601_v27 = vpack.c.bf16 %v583_v22, %v582_v13  ;;  %v570_v28 = vmax.f32 %v486_v16, 0.0 }
 0x103   : > { %v481_v26 = vadd.f32 %v1635_v63, %v480_v24  ;;  %v600_v30 = vpack.c.bf16 %v581_v25, %v580_v18  ;;  %v1348_v31 = vpop.f32.mrb[12].mxu1  ;;  %v568_v32 = vmax.f32 %v478_v20, 0.0 }
 0x104   : > { %v571_v29 = vmax.f32 %v489_v23, 0.0  ;;  %v550_v35 = vadd.f32 %v1348_v31, %v1635_v63  ;;  %v541_v36 = vpop.f32.mrb[13].mxu1 }
 0x105   : > { %v569_v33 = vmax.f32 %v481_v26, 0.0  ;;  %v542_v39 = vadd.f32 %v1635_v63, %v541_v36  ;;  %v1349_v40 = vpop.f32.mrb[14].mxu1 }
 0x106   : > { %v595_v38 = vpack.c.bf16 %v571_v29, %v570_v28  ;;  %v586_v42 = vmax.f32 %v550_v35, 0.0  ;;  %v553_v43 = vadd.f32 %v1349_v40, %v1635_v63  ;;  %v544_v44 = vpop.f32.mrb[15].mxu1 }
 0x107   : > { %v594_v41 = vpack.c.bf16 %v569_v33, %v568_v32  ;;  %v584_v45 = vmax.f32 %v542_v39, 0.0  ;;  %v545_v46 = vadd.f32 %v1635_v63, %v544_v44  ;;  %v1471_v63 = vld [vmem:[%s1802_s5 + $0x30] sm:$0xff]  }
 0x108   : > { %v587_v47 = vmax.f32 %v553_v43, 0.0  ;;  %1410 = vmatprep.subr.bf16.mxu0 %v1471_v63 }
 0x109   : > { %1378 = vmatprep.mubr.bf16.mxu1 %v594_v41  ;;  %v585_v48 = vmax.f32 %v545_v46, 0.0  ;;  %1411 = vmatpush3.bf16.msra.mxu0 %v1471_v63 }
 0x10a   : > { %1379 = vmatmul.mubr.bf16.gmra.mrb[28].mxu1 %v595_v38  ;;  %v603_v49 = vpack.c.bf16 %v587_v47, %v586_v42 }
 0x10b   : > { %1382 = vmatprep.mubr.bf16.mxu1 %v1651_v37  ;;  %v602_v50 = vpack.c.bf16 %v585_v48, %v584_v45  ;;  %v1472_v37 = vld [vmem:[%s1802_s5 + $0x38] sm:$0xff]  }
 0x10c   : > { %1412 = vmatprep.subr.bf16.mxu0 %v1472_v37 }
 0x10d   : > { %1413 = vmatpush3.bf16.msra.mxu0 %v1472_v37 }
 0x112   : > { %1383 = vmatmul.mubr.bf16.gmra.mrb[32].mxu1 %v1649_v34  ;;  %v1684_v34 = vld [vmem:[%s1801_s4] ss:$0 sm:$0xff] }
 0x113   : > { %1386 = vmatprep.mubr.bf16.mxu1 %v598_v2 }
 0x11a   : > { %1387 = vmatmul.mubr.bf16.gmra.mrb[36].mxu1 %v599_v62 }
 0x11b   : > { %1390 = vmatprep.mubr.bf16.mxu1 %v600_v30 }
 0x122   : > { %1391 = vmatmul.mubr.bf16.gmra.mrb[40].mxu1 %v601_v27 }
 0x123   : > { %1394 = vmatprep.mubr.bf16.mxu1 %v602_v50 }
 0x12a   : > { %1395 = vmatmul.mubr.bf16.gmra.mrb[44].mxu1 %v603_v49 }
 0x1c5   : > { %v1368_v51 = vpop.f32.mrb[16].mxu1 }
 0x1c6   : > { %v718_v52 = vadd.f32 %v1368_v51, %v1684_v34  ;;  %v709_v53 = vpop.f32.mrb[17].mxu1 }
 0x1c7   : > { %v710_v54 = vadd.f32 %v1684_v34, %v709_v53  ;;  %v1369_v55 = vpop.f32.mrb[18].mxu1 }
 0x1c8   : > { %v721_v56 = vadd.f32 %v1369_v55, %v1684_v34  ;;  %v712_v57 = vpop.f32.mrb[19].mxu1  ;;  %v838_v59 = vmax.f32 %v718_v52, 0.0 }
 0x1c9   : > { %v713_v58 = vadd.f32 %v1684_v34, %v712_v57  ;;  %v836_v61 = vmax.f32 %v710_v54, 0.0 }
 0x1ca   : > { %v839_v60 = vmax.f32 %v721_v56, 0.0 }
 0x1cb   : > { %v837_v62 = vmax.f32 %v713_v58, 0.0 }
 0x1cc   : > { %v869_v0 = vpack.c.bf16 %v839_v60, %v838_v59 }
 0x1cd   : > { %v868_v1 = vpack.c.bf16 %v837_v62, %v836_v61  ;;  %v1372_v2 = vpop.f32.mrb[20].mxu1 }
 0x1ce   : > { %v734_v3 = vadd.f32 %v1372_v2, %v1684_v34  ;;  %v725_v4 = vpop.f32.mrb[21].mxu1 }
 0x1cf   : > { %v726_v5 = vadd.f32 %v1684_v34, %v725_v4  ;;  %v1373_v6 = vpop.f32.mrb[22].mxu1  ;;  %1414 = vmatprep.mubr.bf16.mxu0 %v868_v1 }
 0x1d0   : > { %v737_v7 = vadd.f32 %v1373_v6, %v1684_v34  ;;  %v728_v8 = vpop.f32.mrb[23].mxu1  ;;  %1415 = vmatmul.mubr.bf16.vlgmr.msra.gmra.mrb[16].mxu0 %v869_v0  ;;  %v842_v10 = vmax.f32 %v734_v3, 0.0 }
 0x1d1   : > { %v729_v9 = vadd.f32 %v1684_v34, %v728_v8  ;;  %v840_v12 = vmax.f32 %v726_v5, 0.0 }
 0x1d2   : > { %v843_v11 = vmax.f32 %v737_v7, 0.0 }
 0x1d3   : > { %v841_v13 = vmax.f32 %v729_v9, 0.0 }
 0x1d4   : > { %v871_v14 = vpack.c.bf16 %v843_v11, %v842_v10 }
 0x1d5   : > { %v870_v15 = vpack.c.bf16 %v841_v13, %v840_v12  ;;  %v1376_v16 = vpop.f32.mrb[24].mxu1 }
 0x1d6   : > { %v750_v17 = vadd.f32 %v1376_v16, %v1684_v34  ;;  %v741_v18 = vpop.f32.mrb[25].mxu1 }
 0x1d7   : > { %v742_v19 = vadd.f32 %v1684_v34, %v741_v18  ;;  %v1377_v20 = vpop.f32.mrb[26].mxu1  ;;  %1418 = vmatprep.mubr.bf16.mxu0 %v870_v15 }
 0x1d8   : > { %v753_v21 = vadd.f32 %v1377_v20, %v1684_v34  ;;  %v744_v22 = vpop.f32.mrb[27].mxu1  ;;  %1419 = vmatmul.mubr.bf16.gmra.mrb[20].mxu0 %v871_v14  ;;  %v846_v24 = vmax.f32 %v750_v17, 0.0 }
 0x1d9   : > { %v745_v23 = vadd.f32 %v1684_v34, %v744_v22  ;;  %v844_v26 = vmax.f32 %v742_v19, 0.0 }
 0x1da   : > { %v847_v25 = vmax.f32 %v753_v21, 0.0 }
 0x1db   : > { %v845_v27 = vmax.f32 %v745_v23, 0.0 }
 0x1dc   : > { %v873_v28 = vpack.c.bf16 %v847_v25, %v846_v24 }
 0x1dd   : > { %v872_v29 = vpack.c.bf16 %v845_v27, %v844_v26  ;;  %v1380_v30 = vpop.f32.mrb[28].mxu1 }
 0x1de   : > { %v766_v31 = vadd.f32 %v1380_v30, %v1684_v34  ;;  %v757_v32 = vpop.f32.mrb[29].mxu1 }
 0x1df   : > { %v758_v33 = vadd.f32 %v1684_v34, %v757_v32  ;;  %v1381_v35 = vpop.f32.mrb[30].mxu1  ;;  %1422 = vmatprep.mubr.bf16.mxu0 %v872_v29 }
 0x1e0   : > { %v769_v36 = vadd.f32 %v1381_v35, %v1684_v34  ;;  %v760_v38 = vpop.f32.mrb[31].mxu1  ;;  %1423 = vmatmul.mubr.bf16.gmra.mrb[24].mxu0 %v873_v28  ;;  %v850_v40 = vmax.f32 %v766_v31, 0.0 }
 0x1e1   : > { %v761_v39 = vadd.f32 %v1684_v34, %v760_v38  ;;  %v848_v42 = vmax.f32 %v758_v33, 0.0 }
 0x1e2   : > { %v851_v41 = vmax.f32 %v769_v36, 0.0 }
 0x1e3   : > { %v849_v43 = vmax.f32 %v761_v39, 0.0  ;;  %v1721_v39 = vld [vmem:[%s1803_s6] ss:$0 sm:$0xff] }
 0x1e4   : > { %v875_v44 = vpack.c.bf16 %v851_v41, %v850_v40 }
 0x1e5   : > { %v874_v45 = vpack.c.bf16 %v849_v43, %v848_v42  ;;  %v1384_v46 = vpop.f32.mrb[32].mxu1 }
 0x1e6   : > { %v782_v47 = vadd.f32 %v1384_v46, %v1684_v34  ;;  %v773_v48 = vpop.f32.mrb[33].mxu1 }
 0x1e7   : > { %v774_v49 = vadd.f32 %v1684_v34, %v773_v48  ;;  %v1385_v50 = vpop.f32.mrb[34].mxu1  ;;  %1426 = vmatprep.mubr.bf16.mxu0 %v874_v45 }
 0x1e8   : > { %v785_v63 = vadd.f32 %v1385_v50, %v1684_v34  ;;  %v776_v37 = vpop.f32.mrb[35].mxu1  ;;  %1427 = vmatmul.mubr.bf16.gmra.mrb[28].mxu0 %v875_v44  ;;  %v854_v52 = vmax.f32 %v782_v47, 0.0 }
 0x1e9   : > { %v777_v51 = vadd.f32 %v1684_v34, %v776_v37  ;;  %v852_v54 = vmax.f32 %v774_v49, 0.0 }
 0x1ea   : > { %v855_v53 = vmax.f32 %v785_v63, 0.0 }
 0x1eb   : > { %v853_v55 = vmax.f32 %v777_v51, 0.0 }
 0x1ec   : > { %v877_v56 = vpack.c.bf16 %v855_v53, %v854_v52 }
 0x1ed   : > { %v876_v57 = vpack.c.bf16 %v853_v55, %v852_v54  ;;  %v1388_v58 = vpop.f32.mrb[36].mxu1 }
 0x1ee   : > { %v798_v59 = vadd.f32 %v1388_v58, %v1684_v34  ;;  %v789_v60 = vpop.f32.mrb[37].mxu1 }
 0x1ef   : > { %v790_v61 = vadd.f32 %v1684_v34, %v789_v60  ;;  %v1389_v62 = vpop.f32.mrb[38].mxu1  ;;  %1430 = vmatprep.mubr.bf16.mxu0 %v876_v57 }
 0x1f0   : > { %v801_v0 = vadd.f32 %v1389_v62, %v1684_v34  ;;  %v792_v1 = vpop.f32.mrb[39].mxu1  ;;  %1431 = vmatmul.mubr.bf16.gmra.mrb[32].mxu0 %v877_v56  ;;  %v858_v3 = vmax.f32 %v798_v59, 0.0 }
 0x1f1   : > { %v793_v2 = vadd.f32 %v1684_v34, %v792_v1  ;;  %v856_v5 = vmax.f32 %v790_v61, 0.0 }
 0x1f2   : > { %v859_v4 = vmax.f32 %v801_v0, 0.0 }
 0x1f3   : > { %v857_v6 = vmax.f32 %v793_v2, 0.0 }
 0x1f4   : > { %v879_v7 = vpack.c.bf16 %v859_v4, %v858_v3 }
 0x1f5   : > { %v878_v8 = vpack.c.bf16 %v857_v6, %v856_v5  ;;  %v1392_v9 = vpop.f32.mrb[40].mxu1 }
 0x1f6   : > { %v814_v10 = vadd.f32 %v1392_v9, %v1684_v34  ;;  %v805_v11 = vpop.f32.mrb[41].mxu1 }
 0x1f7   : > { %v806_v12 = vadd.f32 %v1684_v34, %v805_v11  ;;  %v1393_v13 = vpop.f32.mrb[42].mxu1  ;;  %1434 = vmatprep.mubr.bf16.mxu0 %v878_v8 }
 0x1f8   : > { %v817_v14 = vadd.f32 %v1393_v13, %v1684_v34  ;;  %v808_v15 = vpop.f32.mrb[43].mxu1  ;;  %1435 = vmatmul.mubr.bf16.gmra.mrb[36].mxu0 %v879_v7  ;;  %v862_v17 = vmax.f32 %v814_v10, 0.0 }
 0x1f9   : > { %v809_v16 = vadd.f32 %v1684_v34, %v808_v15  ;;  %v860_v19 = vmax.f32 %v806_v12, 0.0 }
 0x1fa   : > { %v863_v18 = vmax.f32 %v817_v14, 0.0 }
 0x1fb   : > { %v861_v20 = vmax.f32 %v809_v16, 0.0 }
 0x1fc   : > { %v881_v21 = vpack.c.bf16 %v863_v18, %v862_v17 }
 0x1fd   : > { %v880_v22 = vpack.c.bf16 %v861_v20, %v860_v19  ;;  %v1396_v23 = vpop.f32.mrb[44].mxu1 }
 0x1fe   : > { %v830_v24 = vadd.f32 %v1396_v23, %v1684_v34  ;;  %v821_v25 = vpop.f32.mrb[45].mxu1 }
 0x1ff   : > { %v822_v26 = vadd.f32 %v1684_v34, %v821_v25  ;;  %v1397_v27 = vpop.f32.mrb[46].mxu1  ;;  %1438 = vmatprep.mubr.bf16.mxu0 %v880_v22 }
 0x200   : > { %v833_v28 = vadd.f32 %v1397_v27, %v1684_v34  ;;  %v824_v29 = vpop.f32.mrb[47].mxu1  ;;  %1439 = vmatmul.mubr.bf16.gmra.mrb[40].mxu0 %v881_v21  ;;  %v866_v31 = vmax.f32 %v830_v24, 0.0 }
 0x201   : > { %v825_v30 = vadd.f32 %v1684_v34, %v824_v29  ;;  %v864_v33 = vmax.f32 %v822_v26, 0.0 }
 0x202   : > { %v867_v32 = vmax.f32 %v833_v28, 0.0 }
 0x203   : > { %v865_v35 = vmax.f32 %v825_v30, 0.0 }
 0x204   : > { %v883_v36 = vpack.c.bf16 %v867_v32, %v866_v31 }
 0x205   : > { %v882_v38 = vpack.c.bf16 %v865_v35, %v864_v33 }
 0x207   : > { %1442 = vmatprep.mubr.bf16.mxu0 %v882_v38 }
 0x208   : > { %1443 = vmatmul.mubr.bf16.gmra.mrb[44].mxu0 %v883_v36 }
 0x2a3   : > { %v1416_v34 = vpop.f32.mrb[16].mxu0 }
 0x2a4   : > { %v998_v40 = vadd.f32 %v1416_v34, %v1721_v39  ;;  %v989_v41 = vpop.f32.mrb[17].mxu0 }
 0x2a5   : > { %v990_v42 = vadd.f32 %v1721_v39, %v989_v41  ;;  %v1417_v43 = vpop.f32.mrb[18].mxu0 }
 0x2a6   : > { %1118 = vst [vmem:[%s1728_s10 + $0x10] sm:$0xff] %v998_v40  ;;  %v1001_v44 = vadd.f32 %v1417_v43, %v1721_v39  ;;  %v992_v45 = vpop.f32.mrb[19].mxu0 }
 0x2a7   : > { %1116 = vst [vmem:[%s1728_s10] sm:$0xff] %v990_v42  ;;  %v993_v46 = vadd.f32 %v1721_v39, %v992_v45 }
 0x2a8   : > { %1119 = vst [vmem:[%s1728_s10 + $0x18] sm:$0xff] %v1001_v44 }
 0x2a9   : > { %1117 = vst [vmem:[%s1728_s10 + $0x8] sm:$0xff] %v993_v46 }
 0x2ab   : > { %v1420_v47 = vpop.f32.mrb[20].mxu0 }
 0x2ac   : > { %v1014_v48 = vadd.f32 %v1420_v47, %v1721_v39  ;;  %v1005_v49 = vpop.f32.mrb[21].mxu0 }
 0x2ad   : > { %v1006_v50 = vadd.f32 %v1721_v39, %v1005_v49  ;;  %v1421_v63 = vpop.f32.mrb[22].mxu0 }
 0x2ae   : > { %1122 = vst [vmem:[%s1728_s10 + $0x30] sm:$0xff] %v1014_v48  ;;  %v1017_v37 = vadd.f32 %v1421_v63, %v1721_v39  ;;  %v1008_v51 = vpop.f32.mrb[23].mxu0 }
 0x2af   : > { %1120 = vst [vmem:[%s1728_s10 + $0x20] sm:$0xff] %v1006_v50  ;;  %v1009_v52 = vadd.f32 %v1721_v39, %v1008_v51 }
 0x2b0   : > { %1123 = vst [vmem:[%s1728_s10 + $0x38] sm:$0xff] %v1017_v37 }
 0x2b1   : > { %1121 = vst [vmem:[%s1728_s10 + $0x28] sm:$0xff] %v1009_v52 }
 0x2b3   : > { %v1424_v53 = vpop.f32.mrb[24].mxu0 }
 0x2b4   : > { %v1030_v54 = vadd.f32 %v1424_v53, %v1721_v39  ;;  %v1021_v55 = vpop.f32.mrb[25].mxu0 }
 0x2b5   : > { %v1022_v56 = vadd.f32 %v1721_v39, %v1021_v55  ;;  %v1425_v57 = vpop.f32.mrb[26].mxu0 }
 0x2b6   : > { %1126 = vst [vmem:[%s1728_s10 + $0x50] sm:$0xff] %v1030_v54  ;;  %v1033_v58 = vadd.f32 %v1425_v57, %v1721_v39  ;;  %v1024_v59 = vpop.f32.mrb[27].mxu0 }
 0x2b7   : > { %1124 = vst [vmem:[%s1728_s10 + $0x40] sm:$0xff] %v1022_v56  ;;  %v1025_v60 = vadd.f32 %v1721_v39, %v1024_v59 }
 0x2b8   : > { %1127 = vst [vmem:[%s1728_s10 + $0x58] sm:$0xff] %v1033_v58 }
 0x2b9   : > { %1125 = vst [vmem:[%s1728_s10 + $0x48] sm:$0xff] %v1025_v60 }
 0x2bb   : > { %v1428_v61 = vpop.f32.mrb[28].mxu0 }
 0x2bc   : > { %v1046_v62 = vadd.f32 %v1428_v61, %v1721_v39  ;;  %v1037_v0 = vpop.f32.mrb[29].mxu0 }
 0x2bd   : > { %v1038_v1 = vadd.f32 %v1721_v39, %v1037_v0  ;;  %v1429_v2 = vpop.f32.mrb[30].mxu0 }
 0x2be   : > { %1130 = vst [vmem:[%s1728_s10 + $0x70] sm:$0xff] %v1046_v62  ;;  %v1049_v3 = vadd.f32 %v1429_v2, %v1721_v39  ;;  %v1040_v4 = vpop.f32.mrb[31].mxu0 }
 0x2bf   : > { %1128 = vst [vmem:[%s1728_s10 + $0x60] sm:$0xff] %v1038_v1  ;;  %v1041_v5 = vadd.f32 %v1721_v39, %v1040_v4 }
 0x2c0   : > { %1131 = vst [vmem:[%s1728_s10 + $0x78] sm:$0xff] %v1049_v3 }
 0x2c1   : > { %1129 = vst [vmem:[%s1728_s10 + $0x68] sm:$0xff] %v1041_v5 }
 0x2c3   : > { %v1432_v6 = vpop.f32.mrb[32].mxu0 }
 0x2c4   : > { %v1062_v7 = vadd.f32 %v1432_v6, %v1721_v39  ;;  %v1053_v8 = vpop.f32.mrb[33].mxu0 }
 0x2c5   : > { %v1054_v9 = vadd.f32 %v1721_v39, %v1053_v8  ;;  %v1433_v10 = vpop.f32.mrb[34].mxu0 }
 0x2c6   : > { %1134 = vst [vmem:[%s1728_s10 + $0x90] sm:$0xff] %v1062_v7  ;;  %v1065_v11 = vadd.f32 %v1433_v10, %v1721_v39  ;;  %v1056_v12 = vpop.f32.mrb[35].mxu0 }
 0x2c7   : > { %1132 = vst [vmem:[%s1728_s10 + $0x80] sm:$0xff] %v1054_v9  ;;  %v1057_v13 = vadd.f32 %v1721_v39, %v1056_v12 }
 0x2c8   : > { %1135 = vst [vmem:[%s1728_s10 + $0x98] sm:$0xff] %v1065_v11 }
 0x2c9   : > { %1133 = vst [vmem:[%s1728_s10 + $0x88] sm:$0xff] %v1057_v13 }
 0x2cb   : > { %v1436_v14 = vpop.f32.mrb[36].mxu0 }
 0x2cc   : > { %v1078_v15 = vadd.f32 %v1436_v14, %v1721_v39  ;;  %v1069_v16 = vpop.f32.mrb[37].mxu0 }
 0x2cd   : > { %v1070_v17 = vadd.f32 %v1721_v39, %v1069_v16  ;;  %v1437_v18 = vpop.f32.mrb[38].mxu0 }
 0x2ce   : > { %1138 = vst [vmem:[%s1728_s10 + $0xb0] sm:$0xff] %v1078_v15  ;;  %v1081_v19 = vadd.f32 %v1437_v18, %v1721_v39  ;;  %v1072_v20 = vpop.f32.mrb[39].mxu0 }
 0x2cf   : > { %1136 = vst [vmem:[%s1728_s10 + $0xa0] sm:$0xff] %v1070_v17  ;;  %v1073_v21 = vadd.f32 %v1721_v39, %v1072_v20 }
 0x2d0   : > { %1139 = vst [vmem:[%s1728_s10 + $0xb8] sm:$0xff] %v1081_v19 }
 0x2d1   : > { %1137 = vst [vmem:[%s1728_s10 + $0xa8] sm:$0xff] %v1073_v21 }
 0x2d3   : > { %v1440_v22 = vpop.f32.mrb[40].mxu0 }
 0x2d4   : > { %v1094_v23 = vadd.f32 %v1440_v22, %v1721_v39  ;;  %v1085_v24 = vpop.f32.mrb[41].mxu0 }
 0x2d5   : > { %v1086_v25 = vadd.f32 %v1721_v39, %v1085_v24  ;;  %v1441_v26 = vpop.f32.mrb[42].mxu0 }
 0x2d6   : > { %1142 = vst [vmem:[%s1728_s10 + $0xd0] sm:$0xff] %v1094_v23  ;;  %v1097_v27 = vadd.f32 %v1441_v26, %v1721_v39  ;;  %v1088_v28 = vpop.f32.mrb[43].mxu0 }
 0x2d7   : > { %1140 = vst [vmem:[%s1728_s10 + $0xc0] sm:$0xff] %v1086_v25  ;;  %v1089_v29 = vadd.f32 %v1721_v39, %v1088_v28 }
 0x2d8   : > { %1143 = vst [vmem:[%s1728_s10 + $0xd8] sm:$0xff] %v1097_v27 }
 0x2d9   : > { %1141 = vst [vmem:[%s1728_s10 + $0xc8] sm:$0xff] %v1089_v29 }
 0x2db   : > { %v1444_v30 = vpop.f32.mrb[44].mxu0 }
 0x2dc   : > { %v1110_v31 = vadd.f32 %v1444_v30, %v1721_v39  ;;  %v1101_v32 = vpop.f32.mrb[45].mxu0 }
 0x2dd   : > { %v1102_v33 = vadd.f32 %v1721_v39, %v1101_v32  ;;  %v1445_v35 = vpop.f32.mrb[46].mxu0 }
 0x2de   : > { %1146 = vst [vmem:[%s1728_s10 + $0xf0] sm:$0xff] %v1110_v31  ;;  %v1113_v36 = vadd.f32 %v1445_v35, %v1721_v39  ;;  %v1104_v38 = vpop.f32.mrb[47].mxu0 }
 0x2df   : > { %1144 = vst [vmem:[%s1728_s10 + $0xe0] sm:$0xff] %v1102_v33  ;;  %v1105_v34 = vadd.f32 %v1721_v39, %v1104_v38 }
 0x2e0   : > { %1147 = vst [vmem:[%s1728_s10 + $0xf8] sm:$0xff] %v1113_v36 }
 0x2e1   : > { %1145 = vst [vmem:[%s1728_s10 + $0xe8] sm:$0xff] %v1105_v34 }
 0x2e2 PF: > { %s17_s24 = sadd.s32 1, %s1479_s24  }
 0x2e3   : > { %p14_p4 = scmp.ge.s32.totalorder %s17_s24, 4  }
 0x2e5   :  { %16 = sbr.rel (!%p14_p4) target bundleno = 1 (0x1), region = 78 }

</bundles_post_ra>
